<compile_context>
chip_gen: v7x
topology: tpu7x:2x2x1
jax: 0.10.0
libtpu: 0.0.40
codegen_flags: <defaults>
</compile_context>

<pallas_src>
import functools

import jax
import jax.numpy as jnp
from jax import lax
from jax.experimental import pallas as pl
from jax.experimental.pallas import tpu as pltpu


def _euclidean_layer_kernel(q_ref, dqf_ref, w_ref, wexp_ref, b_ref,
                            out_ref, doutf_ref, *, activation, D):
    q = q_ref[...].astype(jnp.float32)        # (TB, n_in)
    x = dqf_ref[...].astype(jnp.float32)      # (TB, n_in*D)   flat dq stream
    w = w_ref[...]                            # (n_width, n_in)       resident
    wexp = wexp_ref[...]                      # (n_in*D, D*n_width)   resident
    b = b_ref[...]                            # (1, n_width)

    # a = F.linear(q, W, b) -> (TB, n_width)
    a = lax.dot_general(q, w, (((1,), (1,)), ((), ())),
                        preferred_element_type=jnp.float32) + b

    # t[b, d*n_width + w] = sum_i dq[b, i, d] * W[w, i]
    # Single lane-dense MXU matmul: M=TB, K=n_in*D, N=D*n_width.
    t = jnp.dot(x, wexp, preferred_element_type=jnp.float32)

    if activation == "SoftPlus":
        # torch.nn.Softplus(beta=1, threshold=20); one exp reused for value
        # and derivative.
        e = jnp.exp(jnp.minimum(a, 20.0))
        out = jnp.where(a > 20.0, a, jnp.log1p(e))
        dg = e / (e + 1.0)
        out_ref[...] = out.astype(out_ref.dtype)
        # Lane-tile the SMALL dg instead of reshaping the big t tensor.
        dg_rep = jnp.concatenate([dg] * D, axis=1)      # (TB, D*n_width)
        doutf_ref[...] = (t * dg_rep).astype(doutf_ref.dtype)
    elif activation == "Linear":
        out_ref[...] = a.astype(out_ref.dtype)
        doutf_ref[...] = t.astype(doutf_ref.dtype)      # dg == 1
    else:
        raise ValueError(f"unsupported activation: {activation}")


def _choose_batch_tile(B, tb_cap):
    """Batch tile: multiple of 8, >=2 grid steps when possible, prefer divisor of B."""
    tb = max(8, (min(tb_cap, max(B, 8)) // 8) * 8)
    if B >= 16:
        # keep at least 2 grid steps (megacore sharding / in-out DMA overlap)
        half = ((-(-B // 2)) + 7) // 8 * 8
        tb = min(tb, half)
    tb = max(8, tb)
    if B % tb != 0:
        # prefer an exact divisor of B (avoids padding the dq stream),
        # but don't shrink the tile by more than ~2x to find one.
        lo = max(8, (tb // 2 // 8) * 8)
        for cand in range(tb, lo - 1, -8):
            if B % cand == 0:
                return cand
    return tb


def euclidean_layer(q, dq, weight, bias, activation="SoftPlus",
                    block_b=4096, stream_dtype=jnp.float32):
    """Pallas-backed EuclideanLayer.forward(q, dq) -> (out, dout)."""
    B, n_in = q.shape
    n_width, n_in_w = weight.shape
    D = dq.shape[-1]
    assert dq.shape == (B, n_in, D)
    assert n_in_w == n_in
    assert bias.shape == (n_width,)
    if activation not in ("SoftPlus", "Linear"):
        raise ValueError(f"unsupported activation: {activation}")

    weight = weight.astype(jnp.float32)
    bias2d = bias.astype(jnp.float32).reshape(1, n_width)
    q = q.astype(stream_dtype)
    # Flat derivative stream -- free reshape, D is already the minor axis.
    dqf = dq.reshape(B, n_in * D).astype(stream_dtype)

    # Block-diagonal expanded weight: W_exp[i*D + d, d*n_width + w] = W[w, i].
    w_exp = (weight.T[:, None, None, :] *
             jnp.eye(D, dtype=jnp.float32)[None, :, :, None])
    w_exp = w_exp.reshape(n_in * D, D * n_width)

    # Tile sizing: clamp by a double-buffered VMEM byte budget, then pick tile.
    itemsize = jnp.dtype(stream_dtype).itemsize
    per_row_bytes = n_in * (1 + D) * itemsize + n_width * (1 + D) * 4
    budget = 40 << 20                                   # streamed-block budget
    tb_budget = max(8, (budget // (2 * per_row_bytes)) // 8 * 8)
    TB = _choose_batch_tile(B, min(block_b, tb_budget))

    Bp = ((B + TB - 1) // TB) * TB
    if Bp != B:                      # ragged tail only; divisor preferred above
        q = jnp.pad(q, ((0, Bp - B), (0, 0)))
        dqf = jnp.pad(dqf, ((0, Bp - B), (0, 0)))

    resident_bytes = 4 * (n_width * n_in + n_in * D * D * n_width + n_width)
    vmem_limit = int(min(max(2 * per_row_bytes * TB + 2 * resident_bytes
                             + (8 << 20), 16 << 20), 48 << 20))

    kernel = functools.partial(_euclidean_layer_kernel,
                               activation=activation, D=D)

    out, doutf = pl.pallas_call(
        kernel,
        out_shape=(
            jax.ShapeDtypeStruct((Bp, n_width), jnp.float32),
            jax.ShapeDtypeStruct((Bp, D * n_width), jnp.float32),
        ),
        grid_spec=pltpu.PrefetchScalarGridSpec(
            num_scalar_prefetch=0,
            grid=(Bp // TB,),
            in_specs=[
                pl.BlockSpec((TB, n_in), lambda i: (i, 0)),
                pl.BlockSpec((TB, n_in * D), lambda i: (i, 0)),
                pl.BlockSpec((n_width, n_in), lambda i: (0, 0)),          # W
                pl.BlockSpec((n_in * D, D * n_width), lambda i: (0, 0)),  # W_exp
                pl.BlockSpec((1, n_width), lambda i: (0, 0)),             # bias
            ],
            out_specs=[
                pl.BlockSpec((TB, n_width), lambda i: (i, 0)),
                pl.BlockSpec((TB, D * n_width), lambda i: (i, 0)),
            ],
        ),
        compiler_params=pltpu.CompilerParams(
            dimension_semantics=("parallel",),
            vmem_limit_bytes=vmem_limit,
        ),
    )(q, dqf, weight, w_exp, bias2d)

    out = out[:B]
    # Restore the module's (B, n_width, D) layout.
    # TODO(synk): this transpose is one extra HBM pass over dout; drop it if the
    # downstream layer can consume the flat (B, D*n_width) slab directly.
    dout = jnp.transpose(doutf[:B].reshape(B, D, n_width), (0, 2, 1))
    return out, dout


def _reference(q, dq, weight, bias, activation="SoftPlus"):
    hi = jax.lax.Precision.HIGHEST
    a = jnp.dot(q, weight.T, precision=hi) + bias
    if activation == "SoftPlus":
        out = jnp.where(a > 20.0, a, jnp.log1p(jnp.exp(jnp.minimum(a, 20.0))))
        ea = jnp.exp(jnp.clip(a, -20.0, 20.0))
        dg = ea / (ea + 1.0)
    else:
        out = a
        dg = jnp.ones_like(a)
    dout = jnp.einsum("bwi,bid->bwd", dg[:, :, None] * weight[None], dq,
                      precision=hi)
    return out, dout


def _run_case(key, B, n_in, n_width, D, activation, block_b=4096,
              stream_dtype=jnp.float32, atol=1e-5, rtol=1e-4):
    kq, kdq, kw, kb = jax.random.split(key, 4)
    q = jax.random.normal(kq, (B, n_in), dtype=jnp.float32)
    dq = jax.random.normal(kdq, (B, n_in, D), dtype=jnp.float32)
    weight = 0.1 * jax.random.normal(kw, (n_width, n_in), dtype=jnp.float32)
    bias = 0.1 * jax.random.normal(kb, (n_width,), dtype=jnp.float32)

    out, dout = euclidean_layer(q, dq, weight, bias, activation=activation,
                                block_b=block_b, stream_dtype=stream_dtype)
    jax.block_until_ready((out, dout))

    ref_out, ref_dout = _reference(q, dq, weight, bias, activation=activation)
    assert out.shape == (B, n_width) and dout.shape == (B, n_width, D)
    assert jnp.allclose(out, ref_out, atol=atol, rtol=rtol), activation
    assert jnp.allclose(dout, ref_dout, atol=atol, rtol=rtol), activation


if __name__ == "__main__":
    key = jax.random.PRNGKey(0)
    k0, k1, k2, k3 = jax.random.split(key, 4)
    # Hidden-layer SoftPlus path (single batch tile).
    _run_case(k0, B=8, n_in=16, n_width=32, D=4, activation="SoftPlus")
    # Multi-tile grid + ragged batch (padding path exercised).
    _run_case(k1, B=20, n_in=24, n_width=48, D=3, activation="SoftPlus",
              block_b=8)
    # Output-layer 'Linear' path (identity activation, no dg multiply).
    _run_case(k2, B=8, n_in=16, n_width=32, D=4, activation="Linear")
    # bf16 streaming path (halved HBM traffic), >=2 grid steps, 256-lane dout.
    _run_case(k3, B=64, n_in=16, n_width=64, D=4, activation="SoftPlus",
              stream_dtype=jnp.bfloat16, atol=3e-2, rtol=3e-2)
    print("KERNEL_OK")
</pallas_src>

<mosaic_0001>
module attributes {stable_mosaic.version = 11 : i64} {
  func.func @_euclidean_layer_kernel(%arg0: i32, %arg1: memref<8x16xf32, #tpu.memory_space<vmem>>, %arg2: memref<8x64xf32, #tpu.memory_space<vmem>>, %arg3: memref<32x16xf32, #tpu.memory_space<vmem>>, %arg4: memref<64x128xf32, #tpu.memory_space<vmem>>, %arg5: memref<1x32xf32, #tpu.memory_space<vmem>>, %arg6: memref<8x32xf32, #tpu.memory_space<vmem>>, %arg7: memref<8x128xf32, #tpu.memory_space<vmem>>) attributes {dimension_semantics = [#tpu.dimension_semantics<parallel>], iteration_bounds = array<i64: 1>, scalar_prefetch = 0 : i64, scratch_operands = 0 : i64, tpu.core_type = #tpu.core_type<tc>, window_params = [{transform_indices = @transform_0, window_bounds = array<i64: 8, 16>}, {transform_indices = @transform_1, window_bounds = array<i64: 8, 64>}, {pipeline_mode = #tpu.pipeline_mode<synchronous>, transform_indices = @transform_2, window_bounds = array<i64: 32, 16>}, {pipeline_mode = #tpu.pipeline_mode<synchronous>, transform_indices = @transform_3, window_bounds = array<i64: 64, 128>}, {pipeline_mode = #tpu.pipeline_mode<synchronous>, transform_indices = @transform_4, window_bounds = array<i64: 1, 32>}, {transform_indices = @transform_5, window_bounds = array<i64: 8, 32>}, {transform_indices = @transform_6, window_bounds = array<i64: 8, 128>}]} {
    %c0 = arith.constant 0 : index
    %c0_0 = arith.constant 0 : index
    %0 = vector.load %arg1[%c0, %c0_0] : memref<8x16xf32, #tpu.memory_space<vmem>>, vector<8x16xf32>
    %c0_1 = arith.constant 0 : index
    %c0_2 = arith.constant 0 : index
    %1 = vector.load %arg2[%c0_1, %c0_2] : memref<8x64xf32, #tpu.memory_space<vmem>>, vector<8x64xf32>
    %c0_3 = arith.constant 0 : index
    %c0_4 = arith.constant 0 : index
    %2 = vector.load %arg3[%c0_3, %c0_4] : memref<32x16xf32, #tpu.memory_space<vmem>>, vector<32x16xf32>
    %c0_5 = arith.constant 0 : index
    %c0_6 = arith.constant 0 : index
    %3 = vector.load %arg4[%c0_5, %c0_6] : memref<64x128xf32, #tpu.memory_space<vmem>>, vector<64x128xf32>
    %c0_7 = arith.constant 0 : index
    %c0_8 = arith.constant 0 : index
    %4 = vector.load %arg5[%c0_7, %c0_8] : memref<1x32xf32, #tpu.memory_space<vmem>>, vector<1x32xf32>
    %cst = arith.constant dense<0.000000e+00> : vector<8x32xf32>
    %5 = tpu.matmul %0, %2, %cst {dimension_numbers = #tpu.dot_dimension_numbers<[1], [1], [0], [0], [0, 0, 1, 0], [], []>} : vector<8x16xf32>, vector<32x16xf32>, vector<8x32xf32> -> vector<8x32xf32>
    %6 = vector.broadcast %4 : vector<1x32xf32> to vector<8x32xf32>
    %7 = arith.addf %5, %6 : vector<8x32xf32>
    %cst_9 = arith.constant dense<0.000000e+00> : vector<8x128xf32>
    %8 = tpu.matmul %1, %3, %cst_9 {dimension_numbers = #tpu.dot_dimension_numbers<[1], [0], [0], [1], [0, 0, 1, 1], [], []>} : vector<8x64xf32>, vector<64x128xf32>, vector<8x128xf32> -> vector<8x128xf32>
    %cst_10 = arith.constant 2.000000e+01 : f32
    %9 = vector.broadcast %cst_10 : f32 to vector<8x32xf32>
    %10 = arith.minimumf %7, %9 : vector<8x32xf32>
    %11 = math.exp %10 : vector<8x32xf32>
    %cst_11 = arith.constant 2.000000e+01 : f32
    %12 = vector.broadcast %cst_11 : f32 to vector<8x32xf32>
    %13 = arith.cmpf ogt, %7, %12 : vector<8x32xf32>
    %14 = math.log1p %11 : vector<8x32xf32>
    %15 = arith.select %13, %7, %14 : vector<8x32xi1>, vector<8x32xf32>
    %cst_12 = arith.constant 1.000000e+00 : f32
    %16 = vector.broadcast %cst_12 : f32 to vector<8x32xf32>
    %17 = arith.addf %11, %16 : vector<8x32xf32>
    %18 = arith.divf %11, %17 : vector<8x32xf32>
    %c0_13 = arith.constant 0 : index
    %c0_14 = arith.constant 0 : index
    %19 = vector.load %arg6[%c0_13, %c0_14] : memref<8x32xf32, #tpu.memory_space<vmem>>, vector<8x32xf32>
    tpu.vector_store %arg6[%c0_13, %c0_14], %15 {strides = array<i32>} : memref<8x32xf32, #tpu.memory_space<vmem>>, vector<8x32xf32>,
    %20 = tpu.concatenate %18, %18, %18, %18 in 1 : vector<8x32xf32>, vector<8x32xf32>, vector<8x32xf32>, vector<8x32xf32> -> vector<8x128xf32>
    %21 = arith.mulf %8, %20 : vector<8x128xf32>
    %c0_15 = arith.constant 0 : index
    %c0_16 = arith.constant 0 : index
    %22 = vector.load %arg7[%c0_15, %c0_16] : memref<8x128xf32, #tpu.memory_space<vmem>>, vector<8x128xf32>
    tpu.vector_store %arg7[%c0_15, %c0_16], %21 {strides = array<i32>} : memref<8x128xf32, #tpu.memory_space<vmem>>, vector<8x128xf32>,
    return
  }
  func.func @transform_0(%arg0: i32) -> (i32, i32) {
    %c0_i32 = arith.constant 0 : i32
    %c0_i32_0 = arith.constant 0 : i32
    return %arg0, %c0_i32 : i32, i32
  }
  func.func @transform_1(%arg0: i32) -> (i32, i32) {
    %c0_i32 = arith.constant 0 : i32
    %c0_i32_0 = arith.constant 0 : i32
    return %arg0, %c0_i32 : i32, i32
  }
  func.func @transform_2(%arg0: i32) -> (i32, i32) {
    %c0_i32 = arith.constant 0 : i32
    %c0_i32_0 = arith.constant 0 : i32
    %c0_i32_1 = arith.constant 0 : i32
    return %c0_i32, %c0_i32_0 : i32, i32
  }
  func.func @transform_3(%arg0: i32) -> (i32, i32) {
    %c0_i32 = arith.constant 0 : i32
    %c0_i32_0 = arith.constant 0 : i32
    %c0_i32_1 = arith.constant 0 : i32
    return %c0_i32, %c0_i32_0 : i32, i32
  }
  func.func @transform_4(%arg0: i32) -> (i32, i32) {
    %c0_i32 = arith.constant 0 : i32
    %c0_i32_0 = arith.constant 0 : i32
    %c0_i32_1 = arith.constant 0 : i32
    return %c0_i32, %c0_i32_0 : i32, i32
  }
  func.func @transform_5(%arg0: i32) -> (i32, i32) {
    %c0_i32 = arith.constant 0 : i32
    %c0_i32_0 = arith.constant 0 : i32
    return %arg0, %c0_i32 : i32, i32
  }
  func.func @transform_6(%arg0: i32) -> (i32, i32) {
    %c0_i32 = arith.constant 0 : i32
    %c0_i32_0 = arith.constant 0 : i32
    return %arg0, %c0_i32 : i32, i32
  }
}

</mosaic_0001>

<bundles_post_ra>
// kernel: tpu_custom_call.1
= control target key start
LH: loop header
LB: loop body
LE: loop exit
PB: predicated region body
PF: predicated region fallthrough
CT: control target
= control target key end

     0   :  { %12 = vsyncpa [#allocation3], 0  ;;  %s561_s0 = inlined_call_operand.vmem [shape: f32[8,16], index: 0, kind: input, shape index: {}]   ;;  %s562_s1 = inlined_call_operand.vmem [shape: f32[8,64], index: 1, kind: input, shape index: {}]   ;;  %s563_s2 = inlined_call_operand.vmem [shape: f32[32,16], index: 2, kind: input, shape index: {}]   ;;  %s564_s3 = inlined_call_operand.hbm [shape: f32[64,128], index: 3, kind: input, shape index: {}]   ;;  %s565_s4 = inlined_call_operand.vmem [shape: f32[1,32], index: 4, kind: input, shape index: {}]   ;;  %s566_s5 = inlined_call_operand.hbm [shape: f32[8,32], index: 5, kind: output, shape index: {0}]   ;;  %s567_s6 = inlined_call_operand.hbm [shape: f32[8,128], index: 6, kind: output, shape index: {1}]  }
   0x1   :  { %13 = vsyncpa [#allocation4], 0 }
   0x2   :  { %14 = vsyncpa [#allocation7], 0  ;;  %s443_s21 = smov [#allocation2]   ;;  %s371_s25 = scalar_lea.hbm %s564_s3, 1024 }
   0x3   :  { %s26_s22 = sshll.u32 %s443_s21, 4  ;;  %p372_p0 = scmp.ne.s32.totalorder %s564_s3, %s371_s25  ;;  %s27_s22 = int_to_ptr.vmem [resolvable:$true] %s26_s22 }
   0x4   :  { %p375_p1 = scmp.lt.u32.totalorder %s371_s25, %s564_s3 }
   0x6   :  { %p377_p2 = pnand %p375_p1, %p372_p0 }
   0x8   :  { %380 = shalt.err (!%p377_p2)
}
   0x9   :  { %s381_s30 = scalar_lea.vmem %s27_s22, 1024  ;;  %p386_p4 = scmp.lt.s32.totalorder %s27_s22, %s27_s22 }
   0xa   :  { %p382_p3 = scmp.ne.s32.totalorder %s27_s22, %s381_s30  ;;  %p387_p5 = scmp.lt.s32.totalorder %s381_s30, %s381_s30 }
   0xc   :  { %p388_p6 = por %p387_p5, %p386_p4 }
   0xe   :  { %p389_p7 = pnand %p388_p6, %p382_p3 }
  0x10   :  { %392 = shalt.err (!%p389_p7)
}
  0x11   :  { %s444_s7 = smov 128   ;;  %s445_s8 = smov 8  }
  0x12   :  { %32 = dma.hbm_to_vmem [thread:$0]  %s564_s3, 1024, %s27_s22, [#allocation3], %s444_s7, %s444_s7, %s445_s8  }
  0x13   :  { %437 = dma.done.wait [#allocation3], 1024  }
  0x14   :  { %438 = vsyncadd [#allocation3], 4294966272  ;;  %v446_v0 = vmov 0.0|0.0   ;;  %vm447_vm0 = vmmov 0   ;;  %v448_v1 = vmov 0.0   ;;  %vm59_vm1 = vcmask 130048  }
  0x15   :  { %334 = vmatprep.subr.bf16.mxu0 %v446_v0  ;;  %312 = vmatprep.mubr.msk.f32.mxu0 %vm447_vm0, %v448_v1  ;;  %v40_v2 = vld [vmem:[%s563_s2] sm:$0xff]  ;;  %v41_v3 = vld [vmem:[%s563_s2 + $0x8] sm:$0xff]  ;;  %vm509_vm2 = vmpackc.low %vm59_vm1, %vm59_vm1  ;;  %vm145_vm3 = vcmask 523264   ;;  %s451_s23 = smov 32   ;;  %vm236_vm4 = vcmask 261120   ;;  %s452_s24 = smov 64  }
  0x16   :  { %342 = vmatprep.subr.bf16.mxu1 %v446_v0  ;;  %331 = vmatprep.mubr.msk.f32.mxu1 %vm447_vm0, %v448_v1  ;;  %v335_v5 = vpack.c.bf16 %v41_v3, %v40_v2  ;;  %v44_v6 = vld [vmem:[#allocation2] sm:$0xff]  ;;  %v45_v7 = vld [vmem:[#allocation2 + $0x8] sm:$0xff]  ;;  %v46_v8 = vld [vmem:[#allocation2 + $0x10] sm:$0xff] }
  0x17   :  { %v47_v9 = vld [vmem:[#allocation2 + $0x18] sm:$0xff]  ;;  %v343_v10 = vpack.c.bf16 %v45_v7, %v44_v6  ;;  %v42_v11 = vld [vmem:[%s563_s2 + $0x10] sm:$0xff]  ;;  %v48_v14 = vld [vmem:[#allocation2 + $0x20] sm:$0xff] }
  0x18   :  { %337 = vmatpush3.bf16.xpose.msk.msra.mxu0 %vm509_vm2, %v335_v5  ;;  %v43_v12 = vld [vmem:[%s563_s2 + $0x18] sm:$0xff]  ;;  %v346_v13 = vpack.c.bf16 %v47_v9, %v46_v8  ;;  %v49_v15 = vld [vmem:[#allocation2 + $0x28] sm:$0xff]  ;;  %v50_v18 = vld [vmem:[#allocation2 + $0x30] sm:$0xff] }
  0x19   :  { %338 = vmatprep.subr.bf16.mxu0 %v446_v0  ;;  %344 = vmatpush3.bf16.msra.mxu1 %v343_v10  ;;  %v339_v16 = vpack.c.bf16 %v43_v12, %v42_v11  ;;  %v349_v17 = vpack.c.bf16 %v49_v15, %v48_v14  ;;  %v51_v19 = vld [vmem:[#allocation2 + $0x38] sm:$0xff]  ;;  %v38_v21 = vld [vmem:[%s561_s0] sm:$0xff]  ;;  %s449_s0 = smov [#allocation5]  }
  0x1a   :  { %345 = vmatprep.subr.bf16.mxu1 %v446_v0  ;;  %v352_v20 = vpack.c.bf16 %v51_v19, %v50_v18  ;;  %v39_v22 = vld [vmem:[%s562_s1] sm:$0xff]  ;;  %s260_s1 = sshll.u32 %s449_s0, 4  ;;  %s261_s1 = int_to_ptr.vmem [resolvable:$true] %s260_s1 }
  0x1b   :  { %v283_v23 = vld [vmem:[%s565_s4] ss:$0 sm:$0xff]  ;;  %s450_s4 = smov 96   ;;  %s393_s25 = scalar_lea.vmem %s261_s1, 128 }
  0x1c   :  { %p394_p8 = scmp.ne.s32.totalorder %s261_s1, %s393_s25  ;;  %p398_p9 = scmp.lt.s32.totalorder %s261_s1, %s261_s1 }
  0x1d   :  { %347 = vmatpush3.bf16.msra.mxu1 %v346_v13  ;;  %p399_p10 = scmp.lt.s32.totalorder %s393_s25, %s393_s25 }
  0x1e   :  { %348 = vmatprep.subr.bf16.mxu1 %v446_v0 }
  0x1f   :  { %p400_p11 = por %p399_p10, %p398_p9 }
  0x20   :  { %341 = vmatpush3.bf16.xpose.msk.msra.mxu0 %vm509_vm2, %v339_v16 }
  0x21   :  { %350 = vmatpush3.bf16.msra.mxu1 %v349_v17  ;;  %p401_p12 = pnand %p400_p11, %p394_p8 }
  0x22   :  { %351 = vmatprep.subr.bf16.mxu1 %v446_v0 }
  0x25   :  { %353 = vmatpush3.bf16.msra.mxu1 %v352_v20 }
  0x27   :  { %313 = vmatmul.mubr.msk.f32.vlgmr.msra.gmra.mrb[0].mxu0 %vm59_vm1, %v38_v21 }
  0x28   :  { %332 = vmatmul.mubr.msk.f32.vlgmr.msra.gmra.mrb[0].mxu1 %vm145_vm3, %v39_v22 }
  0xfa   :  { %v141_v24 = vpop.f32.mrb[0].mxu0 }
  0xfb   :  { %v142_v25 = vadd.f32 %v283_v23, %v141_v24  ;;  %v314_v26 = vpop.f32.mrb[1].mxu0  ;;  %v215_v31 = vpop.f32.mrb[0].mxu1 }
  0xfc   :  { %v333_v33 = vpop.f32.mrb[1].mxu1 }
  0xfd   :  { %v219_v27 = vmin.f32 %v142_v25, 20.0  ;;  %vm222_vm6 = vcmp.gt.f32.partialorder %v142_v25, 20.0 }
  0xff   :  { %v220_v28 = vmul.f32 1.442695, %v219_v27 }
 0x101   :  { %365 = vpow2.f32 %v220_v28 }
 0x10b   :  { %v366_v29 = vpop.eup %365 }
 0x10c   :  { %v223_v30 = vadd.f32 1.0, %v366_v29  ;;  %v226_v32 = vmul.f32 -0.5, %v366_v29  ;;  %v229_v35 = vand.u32 2147483647, %v366_v29 }
 0x10e   :  { %367 = vrcp.f32 %v223_v30  ;;  %v227_v34 = vadd.f32 1.0, %v226_v32  ;;  %vm230_vm5 = vcmp.lt.f32.partialorder %v229_v35, 0.0004427343 }
 0x10f   :  { %369 = vlog2.f32 %v223_v30 }
 0x110   :  { %v228_v40 = vmul.f32 %v366_v29, %v227_v34 }
 0x118   :  { %v368_v36 = vpop.eup %367 }
 0x119   :  { %v370_v37 = vpop.eup %369  ;;  %v235_v38 = vmul.f32 %v368_v36, %v366_v29 }
 0x11a   :  { %v225_v39 = vmul.f32 0.6931472, %v370_v37 }
 0x11b   :  { %245 = vrot.lane.b32.xlu1 %v235_v38, %s450_s4  ;;  %239 = vrot.lane.b32.xlu0 %v235_v38, %s451_s23 }
 0x11c   :  { %v231_v41 = vsel %vm230_vm5, %v228_v40, %v225_v39 }
 0x11d   :  { %v232_v42 = vsel %vm222_vm6, %v142_v25, %v231_v41 }
 0x11e   :  { %237 = vst.msk [vmem:[#allocation5] sm:$0xff] %vm236_vm4, %v232_v42 }
 0x11f   :  { %242 = vrot.lane.b32.xlu0 %v235_v38, %s452_s24 }
 0x120   :  { %404 = shalt.err (!%p401_p12)
}
 0x121   :  { %s405_s28 = scalar_lea.hbm %s566_s5, 128 }
 0x122   :  { %p406_p13 = scmp.ne.s32.totalorder %s566_s5, %s405_s28  ;;  %p409_p0 = scmp.lt.u32.totalorder %s405_s28, %s566_s5 }
 0x124   :  { %p411_p1 = pnand %p409_p0, %p406_p13 }
 0x126   :  { %414 = shalt.err (!%p411_p1)
}
 0x127   :  { %263 = dma.vmem_to_hbm [thread:$0]  %s261_s1, 128, %s566_s5, [#allocation4]   ;;  %vm250_vm7 = vcmask 785408  }
 0x128   :  { %s453_s11 = smov [#allocation6]  }
 0x129   :  { %s270_s12 = sshll.u32 %s453_s11, 4  ;;  %s271_s12 = int_to_ptr.vmem [resolvable:$true] %s270_s12 }
 0x12a   :  { %s415_s13 = scalar_lea.vmem %s271_s12, 128  ;;  %p420_p3 = scmp.lt.s32.totalorder %s271_s12, %s271_s12 }
 0x12b   :  { %p416_p2 = scmp.ne.s32.totalorder %s271_s12, %s415_s13  ;;  %p421_p4 = scmp.lt.s32.totalorder %s415_s13, %s415_s13 }
 0x12d   :  { %p422_p5 = por %p421_p4, %p420_p3 }
 0x12f   :  { %p423_p6 = pnand %p422_p5, %p416_p2 }
 0x18d   :  { %v240_v43 = vpop.permute.xlu0 %239  ;;  %v246_v46 = vpop.permute.xlu1 %245 }
 0x18e   :  { %v248_v44 = vsel %vm236_vm4, %v235_v38, %v240_v43 }
 0x191   :  { %v243_v45 = vpop.permute.xlu0 %242 }
 0x192   :  { %v249_v47 = vsel %vm145_vm3, %v248_v44, %v243_v45 }
 0x193   :  { %v251_v48 = vsel %vm250_vm7, %v249_v47, %v246_v46 }
 0x194   :  { %v252_v49 = vmul.f32 %v251_v48, %v215_v31 }
 0x196   :  { %253 = vst [vmem:[#allocation6] sm:$0xff] %v252_v49 }
 0x197   :  { %426 = shalt.err (!%p423_p6)
}
 0x198   :  { %s427_s3 = scalar_lea.hbm %s567_s6, 128 }
 0x199   :  { %p428_p7 = scmp.ne.s32.totalorder %s567_s6, %s427_s3  ;;  %p431_p8 = scmp.lt.u32.totalorder %s427_s3, %s567_s6 }
 0x19b   :  { %p433_p9 = pnand %p431_p8, %p428_p7 }
 0x19d   :  { %436 = shalt.err (!%p433_p9)
}
 0x19e   :  { %273 = dma.vmem_to_hbm [thread:$0]  %s271_s12, 128, %s567_s6, [#allocation7]  }
 0x19f   :  { %439 = dma.done.wait [#allocation4], 128  }
 0x1a0   :  { %440 = vsyncadd [#allocation4], 4294967168 }
 0x1a1   :  { %441 = dma.done.wait [#allocation7], 128  }
 0x1a2   :  { %442 = vsyncadd [#allocation7], 4294967168 }
 0x1a3   :  { %280 = vsyncpa [#allocation3], 1 }
 0x1a4   :  { %281 = vsyncpa [#allocation4], 1 }
 0x1a5   :  { %282 = vsyncpa [#allocation7], 1 }

</bundles_post_ra>
